<compile_context>
chip_gen: v7x
topology: tpu7x:2x2x1
jax: 0.10.0
libtpu: 0.0.40
codegen_flags: <defaults>
</compile_context>

<pallas_src>
import jax
import jax.numpy as jnp
from jax.experimental import pallas as pl
from jax.experimental.pallas import tpu as pltpu


def gaussian_kernel(x_ref, c_ref, coef_ref, o_ref):
    # x_ref:    (TB, D) tile of the input batch, VMEM (streamed)
    # c_ref:    (1, D)  Gaussian center, VMEM (resident across the grid)
    # coef_ref: (1,)    precomputed -1/(2*w^2), SMEM scalar
    # o_ref:    (1, TB) lane-dense output row tile
    x = x_ref[...]                                   # (TB, D)
    c = c_ref[...]                                   # (1, D)
    diff = x - c                                     # broadcast over batch rows
    d2 = diff * diff                                 # (TB, D)

    # Lane-dense squared distances: (1, D) . (TB, D)^T -> (1, TB) on the MXU.
    # Each output lane b only sums its own row b, so garbage rows in a ragged
    # last block cannot contaminate valid lanes.
    ones_row = jnp.ones((1, d2.shape[1]), dtype=jnp.float32)
    sq = jax.lax.dot_general(
        ones_row, d2,
        dimension_numbers=(((1,), (1,)), ((), ())),
        precision=jax.lax.Precision.HIGHEST,
        preferred_element_type=jnp.float32)          # (1, TB)

    o_ref[...] = jnp.exp(sq * coef_ref[0])           # (1, TB), unmasked vst


def _round_down(n, m):
    return (n // m) * m


def _select_tile_b(B: int, D: int) -> int:
    """Pick the batch tile size (static Python ints only)."""
    lane_row_bytes = max(D, 128) * 4            # lane-padded f32 bytes per row in VMEM
    target_tile_bytes = 8 * 1024 * 1024         # ~8 MiB of (padded) x per grid step
    vmem_budget_bytes = 40 * 1024 * 1024        # 2x x double-buffer + ~2 tile temps
    tile_b = min(target_tile_bytes // lane_row_bytes,
                 vmem_budget_bytes // (4 * lane_row_bytes))
    tile_b = max(128, _round_down(tile_b, 128))
    if B >= 2 * 128:
        # Guarantee >=2 grid steps so both v7x TensorCores split the batch.
        tile_b = min(tile_b, max(128, _round_down(B // 2, 128)))
    if tile_b >= B:
        # Single grid step: block == full array, no (8,128) divisibility needed.
        tile_b = B
    return tile_b


@jax.jit
def gaussian_function_node(x, center, width):
    """x: (B, D) f32, center: (D,) f32, width: scalar f32 -> (B, 1) f32."""
    B, D = x.shape
    x = x.astype(jnp.float32)
    c2 = center.reshape(1, D).astype(jnp.float32)

    # Hoisted scalar math: clamp(width) and the exp coefficient -1/(2*w^2).
    w = jnp.maximum(jnp.asarray(width, dtype=jnp.float32), 1e-6)
    coef = (-1.0 / (2.0 * w * w)).reshape(1)         # (1,) f32, lives in SMEM

    tile_b = _select_tile_b(B, D)
    num_steps = pl.cdiv(B, tile_b)                   # ragged last block handled by Pallas

    out_row = pl.pallas_call(
        gaussian_kernel,
        out_shape=jax.ShapeDtypeStruct((1, B), jnp.float32),
        grid_spec=pltpu.PrefetchScalarGridSpec(
            num_scalar_prefetch=0,
            grid=(num_steps,),
            in_specs=[
                pl.BlockSpec((tile_b, D), lambda i: (i, 0)),        # x tile (streamed)
                pl.BlockSpec((1, D), lambda i: (0, 0)),             # center (resident)
                pl.BlockSpec(memory_space=pltpu.MemorySpace.SMEM),  # coef scalar
            ],
            out_specs=pl.BlockSpec((1, tile_b), lambda i: (0, i)),  # lane-dense row
        ),
        compiler_params=pltpu.CompilerParams(
            dimension_semantics=("parallel",),
            vmem_limit_bytes=48 * 1024 * 1024,       # fits v7x's 64 MiB physical VMEM
        ),
    )(x, c2, coef)

    return out_row[0, :].reshape(B, 1)


def gaussian_reference(x, center, width):
    w = jnp.maximum(width, 1e-6)
    sq = jnp.sum((x - center[None, :]) ** 2, axis=1, keepdims=True)
    return jnp.exp(-sq / (2.0 * w * w))


if __name__ == "__main__":
    key = jax.random.PRNGKey(0)
    k_x, k_c = jax.random.split(key)

    B, D = 16, 32                      # small shapes: batch=16, input_dim=32
    x = jax.random.normal(k_x, (B, D), dtype=jnp.float32)

    # Deterministic parameter init (mirrors torch.randn(input_dim), width=1.0)
    center = jax.random.normal(k_c, (D,), dtype=jnp.float32)
    width = jnp.float32(1.0)

    out = gaussian_function_node(x, center, width)
    out = jax.block_until_ready(out)

    ref = gaussian_reference(x, center, width)
    assert out.shape == (B, 1)
    assert jnp.allclose(out, ref, atol=1e-5, rtol=1e-5)

    # Multi-step grid with a ragged (unpadded) last block: 300 = 2*128 + 44.
    B2 = 300
    x2 = jax.random.normal(k_x, (B2, D), dtype=jnp.float32)
    out2 = jax.block_until_ready(gaussian_function_node(x2, center, width))
    ref2 = gaussian_reference(x2, center, width)
    assert out2.shape == (B2, 1)
    assert jnp.allclose(out2, ref2, atol=1e-5, rtol=1e-5)

    print("KERNEL_OK")
</pallas_src>

<mosaic_0001>
module attributes {stable_mosaic.version = 11 : i64} {
  func.func @gaussian_kernel(%arg0: i32, %arg1: memref<16x32xf32, #tpu.memory_space<vmem>>, %arg2: memref<1x32xf32, #tpu.memory_space<vmem>>, %arg3: memref<1xf32, #tpu.memory_space<smem>>, %arg4: memref<1x16xf32, #tpu.memory_space<vmem>>) attributes {dimension_semantics = [#tpu.dimension_semantics<parallel>], iteration_bounds = array<i64: 1>, scalar_prefetch = 0 : i64, scratch_operands = 0 : i64, tpu.core_type = #tpu.core_type<tc>, window_params = [{transform_indices = @transform_0, window_bounds = array<i64: 16, 32>}, {pipeline_mode = #tpu.pipeline_mode<synchronous>, transform_indices = @transform_1, window_bounds = array<i64: 1, 32>}, {transform_indices = @transform_2, window_bounds = array<i64: 1>}, {transform_indices = @transform_3, window_bounds = array<i64: 1, 16>}]} {
    %c0 = arith.constant 0 : index
    %c0_0 = arith.constant 0 : index
    %0 = vector.load %arg1[%c0, %c0_0] : memref<16x32xf32, #tpu.memory_space<vmem>>, vector<16x32xf32>
    %c0_1 = arith.constant 0 : index
    %c0_2 = arith.constant 0 : index
    %1 = vector.load %arg2[%c0_1, %c0_2] : memref<1x32xf32, #tpu.memory_space<vmem>>, vector<1x32xf32>
    %2 = vector.broadcast %1 : vector<1x32xf32> to vector<16x32xf32>
    %3 = arith.subf %0, %2 : vector<16x32xf32>
    %4 = arith.mulf %3, %3 : vector<16x32xf32>
    %cst = arith.constant 1.000000e+00 : f32
    %5 = vector.broadcast %cst : f32 to vector<1x32xf32>
    %cst_3 = arith.constant dense<0.000000e+00> : vector<1x16xf32>
    %6 = tpu.matmul %5, %4, %cst_3 {dimension_numbers = #tpu.dot_dimension_numbers<[1], [1], [0], [0], [0, 0, 1, 0], [], []>, precision = #tpu.contract_precision<fp32>} : vector<1x32xf32>, vector<16x32xf32>, vector<1x16xf32> -> vector<1x16xf32>
    %c0_4 = arith.constant 0 : index
    %7 = memref.load %arg3[%c0_4] : memref<1xf32, #tpu.memory_space<smem>>
    %8 = vector.broadcast %7 : f32 to vector<1x16xf32>
    %9 = arith.mulf %6, %8 : vector<1x16xf32>
    %10 = math.exp %9 : vector<1x16xf32>
    %c0_5 = arith.constant 0 : index
    %c0_6 = arith.constant 0 : index
    %11 = vector.load %arg4[%c0_5, %c0_6] : memref<1x16xf32, #tpu.memory_space<vmem>>, vector<1x16xf32>
    tpu.vector_store %arg4[%c0_5, %c0_6], %10 {strides = array<i32>} : memref<1x16xf32, #tpu.memory_space<vmem>>, vector<1x16xf32>,
    return
  }
  func.func @transform_0(%arg0: i32) -> (i32, i32) {
    %c0_i32 = arith.constant 0 : i32
    %c0_i32_0 = arith.constant 0 : i32
    return %arg0, %c0_i32 : i32, i32
  }
  func.func @transform_1(%arg0: i32) -> (i32, i32) {
    %c0_i32 = arith.constant 0 : i32
    %c0_i32_0 = arith.constant 0 : i32
    %c0_i32_1 = arith.constant 0 : i32
    return %c0_i32, %c0_i32_0 : i32, i32
  }
  func.func @transform_2(%arg0: i32) -> i32 {
    %c0_i32 = arith.constant 0 : i32
    %c0_i32_0 = arith.constant 0 : i32
    return %c0_i32 : i32
  }
  func.func @transform_3(%arg0: i32) -> (i32, i32) {
    %c0_i32 = arith.constant 0 : i32
    %c0_i32_0 = arith.constant 0 : i32
    return %c0_i32, %arg0 : i32, i32
  }
}

</mosaic_0001>

<bundles_post_ra>
// kernel: gaussian_function_node.1
= control target key start
LH: loop header
LB: loop body
LE: loop exit
PB: predicated region body
PF: predicated region fallthrough
CT: control target
= control target key end

     0   :  { %v642_v3 = vmov 0.0|0.0   ;;  %s704_s0 = inlined_call_operand.vmem [shape: f32[16,32], index: 0, kind: input, shape index: {}]   ;;  %s705_s1 = inlined_call_operand.vmem [shape: f32[1,32], index: 1, kind: input, shape index: {}]   ;;  %s706_s2 = inlined_call_operand.<no memory space> [shape: f32[1], index: 2, kind: input, shape index: {}]   ;;  %s707_s3 = inlined_call_operand.hbm [shape: f32[1,16], index: 3, kind: output, shape index: {}]  }
   0x1   :  { %v16_v0 = vld [vmem:[%s704_s0] sm:$0xff]  ;;  %v17_v1 = vld [vmem:[%s704_s0 + $0x8] sm:$0xff]  ;;  %583 = vmatprep.subr.bf16.mxu1 %v642_v3  ;;  %592 = vmatprep.subr.bf16.mxu0 %v642_v3 }
   0x2   :  { %v519_v2 = vld [vmem:[%s705_s1] ss:$0 sm:$0xff] }
   0x3   :  { %v25_v4 = vsub.f32 %v16_v0, %v519_v2  ;;  %v26_v5 = vsub.f32 %v17_v1, %v519_v2 }
   0x4   :  { %9 = vsyncpa [#allocation4], 0  ;;  %vm29_vm0 = vcmask 261120   ;;  %vm643_vm1 = vmmov 0   ;;  %v644_v6 = vmov 0.0   ;;  %v645_v9 = vmov 0  }
   0x5   :  { %545 = vmatprep.mubr.msk.f32.mxu1 %vm643_vm1, %v644_v6  ;;  %566 = vmatprep.mubr.msk.f32.mxu0 %vm643_vm1, %v644_v6  ;;  %v27_v7 = vmul.f32 %v25_v4, %v25_v4  ;;  %v28_v8 = vmul.f32 %v26_v5, %v26_v5  ;;  %v31_v10 = vsel %vm29_vm0, 1.0, %v645_v9  ;;  %v646_v31 = vmov 1.0   ;;  %s647_s18 = smov [#allocation3]  }
   0x6   :  { %v107_v11 = vsub.f32 %v31_v10, %v31_v10  ;;  %v499_v34 = vstv %s706_s2  ;;  %s511_s19 = sshll.u32 %s647_s18, 4  ;;  %vm503_vm2 = vcmask 122880   ;;  %s512_s19 = int_to_ptr.vmem [resolvable:$true] %s511_s19 }
   0x7   :  { %v34_v12 = vsel %vm29_vm0, %v27_v7, 0  ;;  %v37_v13 = vsel %vm29_vm0, %v28_v8, 0  ;;  %s618_s20 = scalar_lea.vmem %s512_s19, 16  ;;  %s622_s21 = scalar_lea.vmem %s512_s19, 32 }
   0x8   :  { %v40_v14 = vand.u32 4294901760, %v34_v12  ;;  %v43_v15 = vand.u32 4294901760, %v37_v13  ;;  %v108_v16 = vand.u32 4294901760, %v107_v11  ;;  %p619_p0 = scmp.ne.s32.totalorder %s512_s19, %s618_s20  ;;  %p623_p1 = scmp.lt.s32.totalorder %s512_s19, %s512_s19 }
   0x9   :  { %p624_p2 = scmp.lt.s32.totalorder %s622_s21, %s618_s20 }
   0xa   :  { %v584_v17 = vpack.c.bf16 %v43_v15, %v40_v14  ;;  %v118_v18 = vsub.f32 %v34_v12, %v40_v14  ;;  %v125_v19 = vsub.f32 %v37_v13, %v43_v15  ;;  %v109_v20 = vsub.f32 %v107_v11, %v108_v16 }
   0xb   :  { %p625_p3 = por %p624_p2, %p623_p1 }
   0xc   :  { %585 = vmatpush3.bf16.xpose.msra.mxu1 %v584_v17  ;;  %594 = vmatpush3.bf16.xpose.msra.mxu0 %v584_v17  ;;  %v119_v21 = vand.u32 4294901760, %v118_v18  ;;  %v126_v22 = vand.u32 4294901760, %v125_v19  ;;  %v110_v25 = vand.u32 4294901760, %v109_v20  ;;  %v590_v30 = vpack.c.bf16 %v125_v19, %v118_v18 }
   0xd   :  { %586 = vmatprep.subr.bf16.mxu1 %v642_v3  ;;  %595 = vmatprep.subr.bf16.mxu0 %v642_v3  ;;  %p626_p4 = pnand %p625_p3, %p619_p0 }
   0xe   :  { %v120_v23 = vsub.f32 %v118_v18, %v119_v21  ;;  %v127_v24 = vsub.f32 %v125_v19, %v126_v22  ;;  %v596_v28 = vpack.c.bf16 %v126_v22, %v119_v21 }
  0x10   :  { %v121_v26 = vand.u32 4294901760, %v120_v23  ;;  %v128_v27 = vand.u32 4294901760, %v127_v24 }
  0x12   :  { %v587_v29 = vpack.c.bf16 %v128_v27, %v121_v26 }
  0x13   :  { %546 = vmatmul.mubr.f32.vlgmr.msra.gmra.mrb[0].mxu1 %v110_v25  ;;  %567 = vmatmul.mubr.f32.vlgmr.msra.gmra.mrb[0].mxu0 %v108_v16 }
  0x14   :  { %588 = vmatpush3.bf16.xpose.msra.mxu1 %v587_v29  ;;  %597 = vmatpush3.bf16.xpose.msra.mxu0 %v596_v28 }
  0x15   :  { %552 = vmatprep.mubr.msk.f32.mxu1 %vm643_vm1, %v644_v6  ;;  %573 = vmatprep.mubr.msk.f32.mxu0 %vm643_vm1, %v644_v6 }
  0x16   :  { %589 = vmatprep.subr.bf16.mxu1 %v642_v3  ;;  %598 = vmatprep.subr.bf16.mxu0 %v642_v3 }
  0x1b   :  { %553 = vmatmul.mubr.msk.f32.vlgmr.msra.gmra.mrb[0].mxu1 %vm29_vm0, %v646_v31  ;;  %574 = vmatmul.mubr.msk.f32.vlgmr.msra.gmra.mrb[0].mxu0 %vm29_vm0, %v646_v31 }
  0x1c   :  { %591 = vmatpush3.bf16.xpose.msra.mxu1 %v590_v30  ;;  %600 = vmatpush3.bf16.xpose.msra.mxu0 %v584_v17 }
  0x1d   :  { %559 = vmatprep.mubr.msk.f32.mxu1 %vm643_vm1, %v644_v6  ;;  %580 = vmatprep.mubr.msk.f32.mxu0 %vm643_vm1, %v644_v6 }
  0x23   :  { %560 = vmatmul.mubr.f32.vlgmr.msra.gmra.mrb[0].mxu1 %v107_v11  ;;  %581 = vmatmul.mubr.msk.f32.vlgmr.msra.gmra.mrb[0].mxu0 %vm29_vm0, %v646_v31 }
  0xf6   :  { %v269_v32 = vpop.f32.mrb[0].mxu1  ;;  %v494_v33 = vpop.f32.mrb[0].mxu0 }
  0xf7   :  { %v601_v35 = vadd.f32 %v494_v33, %v269_v32  ;;  %v561_v36 = vpop.f32.mrb[1].mxu1  ;;  %v582_v37 = vpop.f32.mrb[1].mxu0 }
  0xf9   :  { %v500_v38 = vmul.f32 %v601_v35, %v499_v34 }
  0xfb   :  { %v501_v39 = vmul.f32 1.442695, %v500_v38 }
  0xfd   :  { %616 = vpow2.f32 %v501_v39 }
 0x107   :  { %v617_v40 = vpop.eup %616 }
 0x108   :  { %504 = vst.msk [vmem:[#allocation3] sm:$0x1] %vm503_vm2, %v617_v40 }
 0x109   :  { %629 = shalt.err (!%p626_p4)
}
 0x10a   :  { %s630_s23 = scalar_lea.hbm %s707_s3, 16 }
 0x10b   :  { %p631_p5 = scmp.ne.s32.totalorder %s707_s3, %s630_s23  ;;  %p634_p6 = scmp.lt.u32.totalorder %s630_s23, %s707_s3 }
 0x10d   :  { %p636_p7 = pnand %p634_p6, %p631_p5 }
 0x10f   :  { %639 = shalt.err (!%p636_p7)
}
 0x110   :  { %514 = dma.vmem_to_hbm [thread:$0]  %s512_s19, 16, %s707_s3, [#allocation4]  }
 0x111   :  { %640 = dma.done.wait [#allocation4], 16  }
 0x112   :  { %641 = vsyncadd [#allocation4], 4294967280 }
 0x113   :  { %518 = vsyncpa [#allocation4], 1 }

</bundles_post_ra>
